<compile_context>
chip_gen: v5e
topology: v5e:2x2
jax: 0.10.0
libtpu: 0.0.40
codegen_flags: <defaults>
</compile_context>

<pallas_src>
import jax
import jax.numpy as jnp
from jax.experimental import pallas as pl
from jax.experimental.pallas import tpu as pltpu

L = 50       # sequence length (fixed by Linear(50, 3))
H = 1280     # hidden size    (fixed by Linear(1280, 1))
OUT = 3      # output classes
NPAD = 128   # lane-padded output width (dense stores; wrapper slices [:, :OUT])
HC = 128     # H-chunk for the VPU reduction (one lane group)


def _kernel(x_ref, w1_ref, b1_ref, w2p_ref, b2_ref, out_ref):
    # x_ref  : (tb, L, H)    block of batch rows
    # w1_ref : (1, 1, H)     Linear(1280 -> 1) weight, broadcastable row
    # b1_ref : (1,)          Linear(1280 -> 1) bias (SMEM scalar)
    # w2p_ref: (L, NPAD)     Linear(50 -> 3) weight^T, zero-padded to 128 lanes
    # b2_ref : (1, NPAD)     Linear(50 -> 3) bias, zero-padded
    # out_ref: (tb, NPAD)
    #
    # Linear(1280 -> 1) on the VPU: accumulate 128-lane chunks with VALU adds,
    # then a single XLU lane reduction (an N=1 MXU matmul would be ingest-bound).
    acc = x_ref[:, :, 0:HC] * w1_ref[:, :, 0:HC]                  # (tb, L, HC)
    for c in range(1, H // HC):                                   # static, unrolled
        lo = c * HC
        acc = acc + x_ref[:, :, lo:lo + HC] * w1_ref[:, :, lo:lo + HC]
    h = jnp.sum(acc, axis=-1)                                     # (tb, L)
    h = jnp.maximum(h + b1_ref[0], 0.0)                           # bias + ReLU
    # Rearrange 'b l 1 -> b (l 1)' is the identity here.  Linear(50 -> 3) as a
    # tiny MXU dot against the lane-padded weight -> one dense (tb, 128) store.
    out = jnp.dot(h, w2p_ref[...], preferred_element_type=jnp.float32)
    out_ref[...] = (out + b2_ref[...]).astype(out_ref.dtype)


def pred_head_raygun(x, W1, B1, W2, B2, *, tb: int = 64):
    """Forward pass of PredHeadRaygun.

    x : (B, L, H) float32
    W1: (1, H), B1: (1,)      -- PyTorch Linear(1280, 1) parameters
    W2: (OUT, L), B2: (OUT,)  -- PyTorch Linear(50, 3) parameters
    Returns (B, OUT) float32.
    """
    B = x.shape[0]
    assert x.shape == (B, L, H)

    # ---- batch-tile selection -----------------------------------------------
    tb = max(1, min(tb, B))
    if B >= 16 and tb >= B:
        # Keep >= 2 grid steps so both v7x TensorCores get work.
        tb = (((B + 1) // 2) + 7) // 8 * 8
    if tb < B and tb % 8 != 0:
        # Output block (tb, NPAD): second-to-last dim must be a multiple of 8
        # unless the block covers the whole batch.
        tb = (tb // 8) * 8
        if tb == 0:
            tb = min(8, B)
    grid0 = pl.cdiv(B, tb)

    # ---- parameter plumbing (tiny, grid-invariant) ---------------------------
    w1 = W1.reshape(1, 1, H).astype(jnp.float32)
    b1 = B1.reshape(1).astype(jnp.float32)
    w2p = jnp.zeros((L, NPAD), jnp.float32).at[:, :OUT].set(
        jnp.transpose(W2).astype(jnp.float32))
    b2p = jnp.zeros((1, NPAD), jnp.float32).at[0, :OUT].set(B2.astype(jnp.float32))

    blk_bytes = tb * L * H * 4
    vmem_limit = min(2 * blk_bytes + 16 * 1024 * 1024, 112 * 1024 * 1024)

    cost = pl.CostEstimate(
        flops=2 * B * L * (H + OUT),
        transcendentals=0,
        bytes_accessed=4 * (B * L * H + B * NPAD + H + L * NPAD + NPAD + 1),
    )

    out = pl.pallas_call(
        _kernel,
        out_shape=jax.ShapeDtypeStruct((B, NPAD), jnp.float32),
        grid_spec=pltpu.PrefetchScalarGridSpec(
            num_scalar_prefetch=0,
            grid=(grid0,),
            in_specs=[
                pl.BlockSpec((tb, L, H), lambda i: (i, 0, 0)),        # x block
                pl.BlockSpec((1, 1, H), lambda i: (0, 0, 0)),         # w1 row
                pl.BlockSpec(memory_space=pltpu.MemorySpace.SMEM),    # b1 scalar
                pl.BlockSpec((L, NPAD), lambda i: (0, 0)),            # w2 padded
                pl.BlockSpec((1, NPAD), lambda i: (0, 0)),            # b2 padded
            ],
            out_specs=pl.BlockSpec((tb, NPAD), lambda i: (i, 0)),
        ),
        compiler_params=pltpu.CompilerParams(
            dimension_semantics=("parallel",),
            vmem_limit_bytes=vmem_limit,
        ),
        cost_estimate=cost,
    )(x.astype(jnp.float32), w1, b1, w2p, b2p)
    return out[:, :OUT]


if __name__ == "__main__":
    key = jax.random.PRNGKey(0)
    kx, k1, kb1, k2, kb2, kx2 = jax.random.split(key, 6)

    # Deterministic synthetic parameters (PyTorch layout: W (out, in), b (out,)).
    W1 = jax.random.normal(k1, (1, H), dtype=jnp.float32) * 0.02
    B1 = jax.random.normal(kb1, (1,), dtype=jnp.float32) * 0.02
    W2 = jax.random.normal(k2, (OUT, L), dtype=jnp.float32) * 0.02
    B2 = jax.random.normal(kb2, (OUT,), dtype=jnp.float32) * 0.02

    fwd = jax.jit(pred_head_raygun, static_argnames=("tb",))

    def reference(x):
        # Pure-JAX reference reproducing the PyTorch forward exactly.
        hp = jax.lax.Precision.HIGHEST
        h = jnp.maximum(jnp.einsum("blh,oh->blo", x, W1, precision=hp) + B1, 0.0)
        h = h.reshape(x.shape[0], L)                    # 'b l h -> b (l h)'
        return jnp.dot(h, W2.T, precision=hp) + B2      # (B, 3)

    # Small single-block batch (tb clamps to B, grid = 1).
    B = 2
    x = jax.random.normal(kx, (B, L, H), dtype=jnp.float32)
    out = jax.block_until_ready(fwd(x, W1, B1, W2, B2))
    assert out.shape == (B, OUT)
    assert jnp.allclose(out, reference(x), rtol=1e-4, atol=1e-4)

    # Medium batch, default tb: auto-splits into 2 blocks (megacore path) with a
    # ragged tail (20 = 16 + 4 valid rows in the last block).
    Bb = 20
    xb = jax.random.normal(kx2, (Bb, L, H), dtype=jnp.float32)
    outb = jax.block_until_ready(fwd(xb, W1, B1, W2, B2))
    assert outb.shape == (Bb, OUT)
    assert jnp.allclose(outb, reference(xb), rtol=1e-4, atol=1e-4)

    # Explicit small tile: grid = 3 blocks (8 + 8 + 4 ragged).
    outc = jax.block_until_ready(fwd(xb, W1, B1, W2, B2, tb=8))
    assert outc.shape == (Bb, OUT)
    assert jnp.allclose(outc, reference(xb), rtol=1e-4, atol=1e-4)

    print("KERNEL_OK")
</pallas_src>

<mosaic_0001>
module attributes {stable_mosaic.version = 11 : i64} {
  func.func @_kernel(%arg0: i32, %arg1: memref<2x50x1280xf32, #tpu.memory_space<vmem>>, %arg2: memref<1x1x1280xf32, #tpu.memory_space<vmem>>, %arg3: memref<1xf32, #tpu.memory_space<smem>>, %arg4: memref<50x128xf32, #tpu.memory_space<vmem>>, %arg5: memref<1x128xf32, #tpu.memory_space<vmem>>, %arg6: memref<2x128xf32, #tpu.memory_space<vmem>>) attributes {dimension_semantics = [#tpu.dimension_semantics<parallel>], iteration_bounds = array<i64: 1>, scalar_prefetch = 0 : i64, scratch_operands = 0 : i64, tpu.core_type = #tpu.core_type<tc>, window_params = [{transform_indices = @transform_0, window_bounds = array<i64: 2, 50, 1280>}, {pipeline_mode = #tpu.pipeline_mode<synchronous>, transform_indices = @transform_1, window_bounds = array<i64: 1, 1, 1280>}, {transform_indices = @transform_2, window_bounds = array<i64: 1>}, {pipeline_mode = #tpu.pipeline_mode<synchronous>, transform_indices = @transform_3, window_bounds = array<i64: 50, 128>}, {pipeline_mode = #tpu.pipeline_mode<synchronous>, transform_indices = @transform_4, window_bounds = array<i64: 1, 128>}, {transform_indices = @transform_5, window_bounds = array<i64: 2, 128>}]} {
    %c0 = arith.constant 0 : index
    %c0_0 = arith.constant 0 : index
    %c0_1 = arith.constant 0 : index
    %0 = vector.load %arg1[%c0, %c0_0, %c0_1] : memref<2x50x1280xf32, #tpu.memory_space<vmem>>, vector<2x50x128xf32>
    %c0_2 = arith.constant 0 : index
    %c0_3 = arith.constant 0 : index
    %c0_4 = arith.constant 0 : index
    %1 = vector.load %arg2[%c0_2, %c0_3, %c0_4] : memref<1x1x1280xf32, #tpu.memory_space<vmem>>, vector<1x1x128xf32>
    %2 = vector.broadcast %1 : vector<1x1x128xf32> to vector<2x50x128xf32>
    %3 = arith.mulf %0, %2 : vector<2x50x128xf32>
    %c0_5 = arith.constant 0 : index
    %c0_6 = arith.constant 0 : index
    %c128 = arith.constant 128 : index
    %4 = vector.load %arg1[%c0_5, %c0_6, %c128] : memref<2x50x1280xf32, #tpu.memory_space<vmem>>, vector<2x50x128xf32>
    %c0_7 = arith.constant 0 : index
    %c0_8 = arith.constant 0 : index
    %c128_9 = arith.constant 128 : index
    %5 = vector.load %arg2[%c0_7, %c0_8, %c128_9] : memref<1x1x1280xf32, #tpu.memory_space<vmem>>, vector<1x1x128xf32>
    %6 = vector.broadcast %5 : vector<1x1x128xf32> to vector<2x50x128xf32>
    %7 = arith.mulf %4, %6 : vector<2x50x128xf32>
    %8 = arith.addf %3, %7 : vector<2x50x128xf32>
    %c0_10 = arith.constant 0 : index
    %c0_11 = arith.constant 0 : index
    %c256 = arith.constant 256 : index
    %9 = vector.load %arg1[%c0_10, %c0_11, %c256] : memref<2x50x1280xf32, #tpu.memory_space<vmem>>, vector<2x50x128xf32>
    %c0_12 = arith.constant 0 : index
    %c0_13 = arith.constant 0 : index
    %c256_14 = arith.constant 256 : index
    %10 = vector.load %arg2[%c0_12, %c0_13, %c256_14] : memref<1x1x1280xf32, #tpu.memory_space<vmem>>, vector<1x1x128xf32>
    %11 = vector.broadcast %10 : vector<1x1x128xf32> to vector<2x50x128xf32>
    %12 = arith.mulf %9, %11 : vector<2x50x128xf32>
    %13 = arith.addf %8, %12 : vector<2x50x128xf32>
    %c0_15 = arith.constant 0 : index
    %c0_16 = arith.constant 0 : index
    %c384 = arith.constant 384 : index
    %14 = vector.load %arg1[%c0_15, %c0_16, %c384] : memref<2x50x1280xf32, #tpu.memory_space<vmem>>, vector<2x50x128xf32>
    %c0_17 = arith.constant 0 : index
    %c0_18 = arith.constant 0 : index
    %c384_19 = arith.constant 384 : index
    %15 = vector.load %arg2[%c0_17, %c0_18, %c384_19] : memref<1x1x1280xf32, #tpu.memory_space<vmem>>, vector<1x1x128xf32>
    %16 = vector.broadcast %15 : vector<1x1x128xf32> to vector<2x50x128xf32>
    %17 = arith.mulf %14, %16 : vector<2x50x128xf32>
    %18 = arith.addf %13, %17 : vector<2x50x128xf32>
    %c0_20 = arith.constant 0 : index
    %c0_21 = arith.constant 0 : index
    %c512 = arith.constant 512 : index
    %19 = vector.load %arg1[%c0_20, %c0_21, %c512] : memref<2x50x1280xf32, #tpu.memory_space<vmem>>, vector<2x50x128xf32>
    %c0_22 = arith.constant 0 : index
    %c0_23 = arith.constant 0 : index
    %c512_24 = arith.constant 512 : index
    %20 = vector.load %arg2[%c0_22, %c0_23, %c512_24] : memref<1x1x1280xf32, #tpu.memory_space<vmem>>, vector<1x1x128xf32>
    %21 = vector.broadcast %20 : vector<1x1x128xf32> to vector<2x50x128xf32>
    %22 = arith.mulf %19, %21 : vector<2x50x128xf32>
    %23 = arith.addf %18, %22 : vector<2x50x128xf32>
    %c0_25 = arith.constant 0 : index
    %c0_26 = arith.constant 0 : index
    %c640 = arith.constant 640 : index
    %24 = vector.load %arg1[%c0_25, %c0_26, %c640] : memref<2x50x1280xf32, #tpu.memory_space<vmem>>, vector<2x50x128xf32>
    %c0_27 = arith.constant 0 : index
    %c0_28 = arith.constant 0 : index
    %c640_29 = arith.constant 640 : index
    %25 = vector.load %arg2[%c0_27, %c0_28, %c640_29] : memref<1x1x1280xf32, #tpu.memory_space<vmem>>, vector<1x1x128xf32>
    %26 = vector.broadcast %25 : vector<1x1x128xf32> to vector<2x50x128xf32>
    %27 = arith.mulf %24, %26 : vector<2x50x128xf32>
    %28 = arith.addf %23, %27 : vector<2x50x128xf32>
    %c0_30 = arith.constant 0 : index
    %c0_31 = arith.constant 0 : index
    %c768 = arith.constant 768 : index
    %29 = vector.load %arg1[%c0_30, %c0_31, %c768] : memref<2x50x1280xf32, #tpu.memory_space<vmem>>, vector<2x50x128xf32>
    %c0_32 = arith.constant 0 : index
    %c0_33 = arith.constant 0 : index
    %c768_34 = arith.constant 768 : index
    %30 = vector.load %arg2[%c0_32, %c0_33, %c768_34] : memref<1x1x1280xf32, #tpu.memory_space<vmem>>, vector<1x1x128xf32>
    %31 = vector.broadcast %30 : vector<1x1x128xf32> to vector<2x50x128xf32>
    %32 = arith.mulf %29, %31 : vector<2x50x128xf32>
    %33 = arith.addf %28, %32 : vector<2x50x128xf32>
    %c0_35 = arith.constant 0 : index
    %c0_36 = arith.constant 0 : index
    %c896 = arith.constant 896 : index
    %34 = vector.load %arg1[%c0_35, %c0_36, %c896] : memref<2x50x1280xf32, #tpu.memory_space<vmem>>, vector<2x50x128xf32>
    %c0_37 = arith.constant 0 : index
    %c0_38 = arith.constant 0 : index
    %c896_39 = arith.constant 896 : index
    %35 = vector.load %arg2[%c0_37, %c0_38, %c896_39] : memref<1x1x1280xf32, #tpu.memory_space<vmem>>, vector<1x1x128xf32>
    %36 = vector.broadcast %35 : vector<1x1x128xf32> to vector<2x50x128xf32>
    %37 = arith.mulf %34, %36 : vector<2x50x128xf32>
    %38 = arith.addf %33, %37 : vector<2x50x128xf32>
    %c0_40 = arith.constant 0 : index
    %c0_41 = arith.constant 0 : index
    %c1024 = arith.constant 1024 : index
    %39 = vector.load %arg1[%c0_40, %c0_41, %c1024] : memref<2x50x1280xf32, #tpu.memory_space<vmem>>, vector<2x50x128xf32>
    %c0_42 = arith.constant 0 : index
    %c0_43 = arith.constant 0 : index
    %c1024_44 = arith.constant 1024 : index
    %40 = vector.load %arg2[%c0_42, %c0_43, %c1024_44] : memref<1x1x1280xf32, #tpu.memory_space<vmem>>, vector<1x1x128xf32>
    %41 = vector.broadcast %40 : vector<1x1x128xf32> to vector<2x50x128xf32>
    %42 = arith.mulf %39, %41 : vector<2x50x128xf32>
    %43 = arith.addf %38, %42 : vector<2x50x128xf32>
    %c0_45 = arith.constant 0 : index
    %c0_46 = arith.constant 0 : index
    %c1152 = arith.constant 1152 : index
    %44 = vector.load %arg1[%c0_45, %c0_46, %c1152] : memref<2x50x1280xf32, #tpu.memory_space<vmem>>, vector<2x50x128xf32>
    %c0_47 = arith.constant 0 : index
    %c0_48 = arith.constant 0 : index
    %c1152_49 = arith.constant 1152 : index
    %45 = vector.load %arg2[%c0_47, %c0_48, %c1152_49] : memref<1x1x1280xf32, #tpu.memory_space<vmem>>, vector<1x1x128xf32>
    %46 = vector.broadcast %45 : vector<1x1x128xf32> to vector<2x50x128xf32>
    %47 = arith.mulf %44, %46 : vector<2x50x128xf32>
    %48 = arith.addf %43, %47 : vector<2x50x128xf32>
    %cst = arith.constant dense<0.000000e+00> : vector<2x50xf32>
    %49 = vector.multi_reduction <add>, %48, %cst [2] : vector<2x50x128xf32> to vector<2x50xf32>
    %c0_50 = arith.constant 0 : index
    %50 = memref.load %arg3[%c0_50] : memref<1xf32, #tpu.memory_space<smem>>
    %51 = vector.broadcast %50 : f32 to vector<2x50xf32>
    %52 = arith.addf %49, %51 : vector<2x50xf32>
    %cst_51 = arith.constant 0.000000e+00 : f32
    %53 = vector.broadcast %cst_51 : f32 to vector<2x50xf32>
    %54 = arith.maximumf %52, %53 : vector<2x50xf32>
    %c0_52 = arith.constant 0 : index
    %c0_53 = arith.constant 0 : index
    %55 = vector.load %arg4[%c0_52, %c0_53] : memref<50x128xf32, #tpu.memory_space<vmem>>, vector<50x128xf32>
    %cst_54 = arith.constant dense<0.000000e+00> : vector<2x128xf32>
    %56 = tpu.matmul %54, %55, %cst_54 {dimension_numbers = #tpu.dot_dimension_numbers<[1], [0], [0], [1], [0, 0, 1, 1], [], []>} : vector<2x50xf32>, vector<50x128xf32>, vector<2x128xf32> -> vector<2x128xf32>
    %c0_55 = arith.constant 0 : index
    %c0_56 = arith.constant 0 : index
    %57 = vector.load %arg5[%c0_55, %c0_56] : memref<1x128xf32, #tpu.memory_space<vmem>>, vector<1x128xf32>
    %58 = vector.broadcast %57 : vector<1x128xf32> to vector<2x128xf32>
    %59 = arith.addf %56, %58 : vector<2x128xf32>
    %c0_57 = arith.constant 0 : index
    %c0_58 = arith.constant 0 : index
    %60 = vector.load %arg6[%c0_57, %c0_58] : memref<2x128xf32, #tpu.memory_space<vmem>>, vector<2x128xf32>
    tpu.vector_store %arg6[%c0_57, %c0_58], %59 {strides = array<i32>} : memref<2x128xf32, #tpu.memory_space<vmem>>, vector<2x128xf32>,
    return
  }
  func.func @transform_0(%arg0: i32) -> (i32, i32, i32) {
    %c0_i32 = arith.constant 0 : i32
    %c0_i32_0 = arith.constant 0 : i32
    %c0_i32_1 = arith.constant 0 : i32
    return %arg0, %c0_i32, %c0_i32_0 : i32, i32, i32
  }
  func.func @transform_1(%arg0: i32) -> (i32, i32, i32) {
    %c0_i32 = arith.constant 0 : i32
    %c0_i32_0 = arith.constant 0 : i32
    %c0_i32_1 = arith.constant 0 : i32
    %c0_i32_2 = arith.constant 0 : i32
    return %c0_i32, %c0_i32_0, %c0_i32_1 : i32, i32, i32
  }
  func.func @transform_2(%arg0: i32) -> i32 {
    %c0_i32 = arith.constant 0 : i32
    %c0_i32_0 = arith.constant 0 : i32
    return %c0_i32 : i32
  }
  func.func @transform_3(%arg0: i32) -> (i32, i32) {
    %c0_i32 = arith.constant 0 : i32
    %c0_i32_0 = arith.constant 0 : i32
    %c0_i32_1 = arith.constant 0 : i32
    return %c0_i32, %c0_i32_0 : i32, i32
  }
  func.func @transform_4(%arg0: i32) -> (i32, i32) {
    %c0_i32 = arith.constant 0 : i32
    %c0_i32_0 = arith.constant 0 : i32
    %c0_i32_1 = arith.constant 0 : i32
    return %c0_i32, %c0_i32_0 : i32, i32
  }
  func.func @transform_5(%arg0: i32) -> (i32, i32) {
    %c0_i32 = arith.constant 0 : i32
    %c0_i32_0 = arith.constant 0 : i32
    return %arg0, %c0_i32 : i32, i32
  }
}

</mosaic_0001>

<bundles_post_ra>
// kernel: pred_head_raygun.1
= control target key start
LH: loop header
LB: loop body
LE: loop exit
PB: predicated region body
PF: predicated region fallthrough
CT: control target
= control target key end

     0   :  { %s1359_s0 = inlined_call_operand.vmem [shape: f32[2,50,1280], index: 0, kind: input, shape index: {}]   ;;  %s1360_s1 = inlined_call_operand.vmem [shape: f32[1,1,1280], index: 1, kind: input, shape index: {}]   ;;  %s1361_s2 = inlined_call_operand.<no memory space> [shape: f32[1], index: 2, kind: input, shape index: {}]   ;;  %s1362_s3 = inlined_call_operand.vmem [shape: f32[50,128], index: 3, kind: input, shape index: {}]   ;;  %s1363_s4 = inlined_call_operand.vmem [shape: f32[1,128], index: 4, kind: input, shape index: {}]   ;;  %s1364_s5 = inlined_call_operand.hbm [shape: f32[2,128], index: 5, kind: output, shape index: {}]  }
   0x1   :  { %v29_v0 = vld [vmem:[%s1359_s0 + $0x230] sm:$0xff]  ;;  %v716_v1 = vld [vmem:[%s1360_s1] ss:$0 sm:$0xff]  ;;  %v61_v2 = vld [vmem:[%s1359_s0 + $0x238] sm:$0xff] }
   0x2   :  { %v724_v3 = vld [vmem:[%s1360_s1 + $0x1] ss:$0 sm:$0xff]  ;;  %v47_v4 = vmul.f32 %v716_v1, %v29_v0  ;;  %v733_v6 = vld [vmem:[%s1360_s1 + $0x2] ss:$0 sm:$0xff]  ;;  %v153_v8 = vld [vmem:[%s1359_s0 + $0x248] sm:$0xff] }
   0x3   :  { %v107_v5 = vld [vmem:[%s1359_s0 + $0x240] sm:$0xff]  ;;  %v79_v7 = vmul.f32 %v724_v3, %v61_v2  ;;  %v199_v11 = vld [vmem:[%s1359_s0 + $0x250] sm:$0xff]  ;;  %v245_v16 = vld [vmem:[%s1359_s0 + $0x258] sm:$0xff] }
   0x4   :  { %v742_v9 = vld [vmem:[%s1360_s1 + $0x3] ss:$0 sm:$0xff]  ;;  %v125_v10 = vmul.f32 %v733_v6, %v107_v5  ;;  %v751_v12 = vld [vmem:[%s1360_s1 + $0x4] ss:$0 sm:$0xff]  ;;  %v757_v15 = vld [vmem:[%s1360_s1 + $0x5] ss:$0 sm:$0xff] }
   0x5   :  { %v93_v13 = vadd.f32 %v79_v7, %v47_v4  ;;  %v171_v14 = vmul.f32 %v742_v9, %v153_v8  ;;  %v217_v18 = vmul.f32 %v751_v12, %v199_v11  ;;  %v766_v19 = vld [vmem:[%s1360_s1 + $0x6] ss:$0 sm:$0xff]  ;;  %v337_v21 = vld [vmem:[%s1359_s0 + $0x268] sm:$0xff]  ;;  %v263_v23 = vmul.f32 %v757_v15, %v245_v16  ;;  %v778_v24 = vld [vmem:[%s1360_s1 + $0x7] ss:$0 sm:$0xff] }
   0x6   :  { %v291_v20 = vld [vmem:[%s1359_s0 + $0x260] sm:$0xff]  ;;  %v783_v25 = vld [vmem:[%s1360_s1 + $0x8] ss:$0 sm:$0xff]  ;;  %v100_v28 = vld [vmem:[%s1359_s0 + $0x10] sm:$0xff]  ;;  %v355_v41 = vmul.f32 %v778_v24, %v337_v21 }
   0x7   :  { %v139_v17 = vadd.f32 %v125_v10, %v93_v13  ;;  %v22_v26 = vld [vmem:[%s1359_s0] sm:$0xff]  ;;  %v54_v27 = vld [vmem:[%s1359_s0 + $0x8] sm:$0xff]  ;;  %v309_v30 = vmul.f32 %v766_v19, %v291_v20  ;;  %v383_v31 = vld [vmem:[%s1359_s0 + $0x270] sm:$0xff]  ;;  %v118_v37 = vmul.f32 %v733_v6, %v100_v28 }
   0x8   :  { %v429_v32 = vld [vmem:[%s1359_s0 + $0x278] sm:$0xff]  ;;  %v40_v33 = vmul.f32 %v716_v1, %v22_v26  ;;  %v72_v34 = vmul.f32 %v724_v3, %v54_v27  ;;  %v809_v36 = vld [vmem:[%s1360_s1 + $0x9] ss:$0 sm:$0xff]  ;;  %v192_v38 = vld [vmem:[%s1359_s0 + $0x20] sm:$0xff]  ;;  %v401_v47 = vmul.f32 %v783_v25, %v383_v31 }
   0x9   :  { %v185_v22 = vadd.f32 %v171_v14, %v139_v17  ;;  %v146_v35 = vld [vmem:[%s1359_s0 + $0x18] sm:$0xff]  ;;  %v238_v39 = vld [vmem:[%s1359_s0 + $0x28] sm:$0xff]  ;;  %v284_v44 = vld [vmem:[%s1359_s0 + $0x30] sm:$0xff]  ;;  %v210_v55 = vmul.f32 %v751_v12, %v192_v38  ;;  %v447_v58 = vmul.f32 %v809_v36, %v429_v32 }
   0xa   :  { %v86_v42 = vadd.f32 %v72_v34, %v40_v33  ;;  %v164_v43 = vmul.f32 %v742_v9, %v146_v35  ;;  %v24_v45 = vld [vmem:[%s1359_s0 + $0xa0] sm:$0xff]  ;;  %v56_v46 = vld [vmem:[%s1359_s0 + $0xa8] sm:$0xff]  ;;  %v330_v48 = vld [vmem:[%s1359_s0 + $0x38] sm:$0xff]  ;;  %v256_v59 = vmul.f32 %v757_v15, %v238_v39  ;;  %v302_v5 = vmul.f32 %v766_v19, %v284_v44 }
   0xb   :  { %v231_v29 = vadd.f32 %v217_v18, %v185_v22  ;;  %v42_v49 = vmul.f32 %v716_v1, %v24_v45  ;;  %v74_v50 = vmul.f32 %v724_v3, %v56_v46  ;;  %v102_v51 = vld [vmem:[%s1359_s0 + $0xb0] sm:$0xff]  ;;  %v148_v52 = vld [vmem:[%s1359_s0 + $0xb8] sm:$0xff]  ;;  %v194_v57 = vld [vmem:[%s1359_s0 + $0xc0] sm:$0xff]  ;;  %v348_v7 = vmul.f32 %v778_v24, %v330_v48 }
   0xc   :  { %v132_v54 = vadd.f32 %v118_v37, %v86_v42  ;;  %v120_v56 = vmul.f32 %v733_v6, %v102_v51  ;;  %v376_v60 = vld [vmem:[%s1359_s0 + $0x40] sm:$0xff]  ;;  %v166_v62 = vmul.f32 %v742_v9, %v148_v52  ;;  %v240_v63 = vld [vmem:[%s1359_s0 + $0xc8] sm:$0xff]  ;;  %v108_v10 = vld [vmem:[%s1359_s0 + $0x290] sm:$0xff]  ;;  %v212_v16 = vmul.f32 %v751_v12, %v194_v57 }
   0xd   :  { %v277_v40 = vadd.f32 %v263_v23, %v231_v29  ;;  %v88_v61 = vadd.f32 %v74_v50, %v42_v49  ;;  %v30_v0 = vld [vmem:[%s1359_s0 + $0x280] sm:$0xff]  ;;  %v62_v8 = vld [vmem:[%s1359_s0 + $0x288] sm:$0xff]  ;;  %v154_v11 = vld [vmem:[%s1359_s0 + $0x298] sm:$0xff]  ;;  %v394_v23 = vmul.f32 %v783_v25, %v376_v60  ;;  %v126_v27 = vmul.f32 %v733_v6, %v108_v10 }
   0xe   :  { %v178_v4 = vadd.f32 %v164_v43, %v132_v54  ;;  %v422_v13 = vld [vmem:[%s1359_s0 + $0x48] sm:$0xff]  ;;  %v286_v17 = vld [vmem:[%s1359_s0 + $0xd0] sm:$0xff]  ;;  %v48_v18 = vmul.f32 %v716_v1, %v30_v0  ;;  %v80_v20 = vmul.f32 %v724_v3, %v62_v8  ;;  %v332_v26 = vld [vmem:[%s1359_s0 + $0xd8] sm:$0xff]  ;;  %v172_v32 = vmul.f32 %v742_v9, %v154_v11 }
   0xf   :  { %v323_v53 = vadd.f32 %v309_v30, %v277_v40  ;;  %v134_v14 = vadd.f32 %v120_v56, %v88_v61  ;;  %v200_v28 = vld [vmem:[%s1359_s0 + $0x2a0] sm:$0xff]  ;;  %v258_v30 = vmul.f32 %v757_v15, %v240_v63  ;;  %v23_v33 = vld [vmem:[%s1359_s0 + $0x50] sm:$0xff]  ;;  %v55_v34 = vld [vmem:[%s1359_s0 + $0x58] sm:$0xff]  ;;  %v440_v39 = vmul.f32 %v809_v36, %v422_v13 }
  0x10   :  { %v224_v22 = vadd.f32 %v210_v55, %v178_v4  ;;  %v94_v31 = vadd.f32 %v80_v20, %v48_v18  ;;  %v101_v35 = vld [vmem:[%s1359_s0 + $0x60] sm:$0xff]  ;;  %v304_v40 = vmul.f32 %v766_v19, %v286_v17  ;;  %v246_v42 = vld [vmem:[%s1359_s0 + $0x2a8] sm:$0xff]  ;;  %v350_v44 = vmul.f32 %v778_v24, %v332_v26  ;;  %v292_v50 = vld [vmem:[%s1359_s0 + $0x2b0] sm:$0xff] }
  0x11   :  { %v369_v2 = vadd.f32 %v355_v41, %v323_v53  ;;  %v180_v29 = vadd.f32 %v166_v62, %v134_v14  ;;  %v378_v41 = vld [vmem:[%s1359_s0 + $0xe0] sm:$0xff]  ;;  %v424_v45 = vld [vmem:[%s1359_s0 + $0xe8] sm:$0xff]  ;;  %v338_v51 = vld [vmem:[%s1359_s0 + $0x2b8] sm:$0xff]  ;;  %v41_v52 = vmul.f32 %v716_v1, %v23_v33  ;;  %v73_v53 = vmul.f32 %v724_v3, %v55_v34 }
  0x12   :  { %v270_v38 = vadd.f32 %v256_v59, %v224_v22  ;;  %v140_v46 = vadd.f32 %v126_v27, %v94_v31  ;;  %v147_v48 = vld [vmem:[%s1359_s0 + $0x68] sm:$0xff]  ;;  %v119_v54 = vmul.f32 %v733_v6, %v101_v35  ;;  %v396_v56 = vmul.f32 %v783_v25, %v378_v41  ;;  %v193_v59 = vld [vmem:[%s1359_s0 + $0x70] sm:$0xff]  ;;  %v109_v4 = vld [vmem:[%s1359_s0 + $0x2e0] sm:$0xff] }
  0x13   :  { %v415_v21 = vadd.f32 %v401_v47, %v369_v2  ;;  %v226_v43 = vadd.f32 %v212_v16, %v180_v29  ;;  %v218_v47 = vmul.f32 %v751_v12, %v200_v28  ;;  %v31_v60 = vld [vmem:[%s1359_s0 + $0x2d0] sm:$0xff]  ;;  %v442_v62 = vmul.f32 %v809_v36, %v424_v45  ;;  %v63_v2 = vld [vmem:[%s1359_s0 + $0x2d8] sm:$0xff]  ;;  %v155_v20 = vld [vmem:[%s1359_s0 + $0x2e8] sm:$0xff] }
  0x14   :  { %v316_v49 = vadd.f32 %v302_v5, %v270_v38  ;;  %v186_v57 = vadd.f32 %v172_v32, %v140_v46  ;;  %v87_v63 = vadd.f32 %v73_v53, %v41_v52  ;;  %v165_v0 = vmul.f32 %v742_v9, %v147_v48  ;;  %v239_v13 = vld [vmem:[%s1359_s0 + $0x78] sm:$0xff]  ;;  %v430_v26 = vld [vmem:[%s1359_s0 + $0x2c8] sm:$0xff]  ;;  %v285_v27 = vld [vmem:[%s1359_s0 + $0x80] sm:$0xff] }
  0x15   :  { %v461_v37 = vadd.f32 %v447_v58, %v415_v21  ;;  %v272_v55 = vadd.f32 %v258_v30, %v226_v43  ;;  %v264_v58 = vmul.f32 %v757_v15, %v246_v42  ;;  %v310_v10 = vmul.f32 %v766_v19, %v292_v50  ;;  %v201_v34 = vld [vmem:[%s1359_s0 + $0x2f0] sm:$0xff]  ;;  %v32_v41 = vld [vmem:[%s1359_s0 + $0x320] sm:$0xff]  ;;  %v247_v48 = vld [vmem:[%s1359_s0 + $0x2f8] sm:$0xff] }
  0x16   :  { %v362_v61 = vadd.f32 %v348_v7, %v316_v49  ;;  %v232_v8 = vadd.f32 %v218_v47, %v186_v57  ;;  %v356_v11 = vmul.f32 %v778_v24, %v338_v51  ;;  %v384_v7 = vld [vmem:[%s1359_s0 + $0x2c0] sm:$0xff]  ;;  %v133_v16 = vadd.f32 %v119_v54, %v87_v63  ;;  %v110_v42 = vld [vmem:[%s1359_s0 + $0x330] sm:$0xff]  ;;  %v423_v51 = vld [vmem:[%s1359_s0 + $0x98] sm:$0xff] }
  0x17   :  { %484 = vadd.xlane.f32.xlu1 %v461_v37  ;;  %v318_v5 = vadd.f32 %v304_v40, %v272_v55  ;;  %v211_v17 = vmul.f32 %v751_v12, %v193_v59  ;;  %v49_v18 = vmul.f32 %v716_v1, %v31_v60  ;;  %v81_v28 = vmul.f32 %v724_v3, %v63_v2  ;;  %v377_v47 = vld [vmem:[%s1359_s0 + $0x90] sm:$0xff]  ;;  %v156_v54 = vld [vmem:[%s1359_s0 + $0x338] sm:$0xff]  ;;  %v339_v57 = vld [vmem:[%s1359_s0 + $0x308] sm:$0xff] }
  0x18   :  { %v408_v14 = vadd.f32 %v394_v23, %v362_v61  ;;  %v278_v22 = vadd.f32 %v264_v58, %v232_v8  ;;  %v331_v23 = vld [vmem:[%s1359_s0 + $0x88] sm:$0xff]  ;;  %v127_v29 = vmul.f32 %v733_v6, %v109_v4  ;;  %v402_v31 = vmul.f32 %v783_v25, %v384_v7  ;;  %v202_v2 = vld [vmem:[%s1359_s0 + $0x340] sm:$0xff]  ;;  %v25_v4 = vld [vmem:[%s1359_s0 + $0xf0] sm:$0xff] }
  0x19   :  { %v364_v21 = vadd.f32 %v350_v44, %v318_v5  ;;  %v179_v32 = vadd.f32 %v165_v0, %v133_v16  ;;  %v257_v33 = vmul.f32 %v757_v15, %v239_v13  ;;  %v95_v38 = vadd.f32 %v81_v28, %v49_v18  ;;  %v57_v13 = vld [vmem:[%s1359_s0 + $0xf8] sm:$0xff]  ;;  %v294_v28 = vld [vmem:[%s1359_s0 + $0x350] sm:$0xff] }
  0x1a   :  { %v454_v30 = vadd.f32 %v440_v39, %v408_v14  ;;  %v324_v37 = vadd.f32 %v310_v10, %v278_v22  ;;  %v173_v40 = vmul.f32 %v742_v9, %v155_v20  ;;  %v64_v39 = vld [vmem:[%s1359_s0 + $0x328] sm:$0xff]  ;;  %v448_v43 = vmul.f32 %v809_v36, %v430_v26  ;;  %v385_v10 = vld [vmem:[%s1359_s0 + $0x310] sm:$0xff]  ;;  %v103_v14 = vld [vmem:[%s1359_s0 + $0x100] sm:$0xff] }
  0x1b   :  { %v410_v35 = vadd.f32 %v396_v56, %v364_v21  ;;  %v225_v44 = vadd.f32 %v211_v17, %v179_v32  ;;  %v303_v45 = vmul.f32 %v766_v19, %v285_v27  ;;  %v349_v46 = vmul.f32 %v778_v24, %v331_v23  ;;  %v293_v56 = vld [vmem:[%s1359_s0 + $0x300] sm:$0xff]  ;;  %v431_v21 = vld [vmem:[%s1359_s0 + $0x318] sm:$0xff]  ;;  %v248_v22 = vld [vmem:[%s1359_s0 + $0x348] sm:$0xff] }
  0x1c   :  { %468 = vadd.xlane.f32.xlu0 %v454_v30  ;;  %v370_v50 = vadd.f32 %v356_v11, %v324_v37  ;;  %v141_v52 = vadd.f32 %v127_v29, %v95_v38  ;;  %v219_v53 = vmul.f32 %v751_v12, %v201_v34  ;;  %v50_v58 = vmul.f32 %v716_v1, %v32_v41  ;;  %v149_v30 = vld [vmem:[%s1359_s0 + $0x108] sm:$0xff]  ;;  %v195_v37 = vld [vmem:[%s1359_s0 + $0x110] sm:$0xff] }
  0x1d   :  { %v456_v49 = vadd.f32 %v442_v62, %v410_v35  ;;  %v271_v55 = vadd.f32 %v257_v33, %v225_v44  ;;  %v82_v59 = vmul.f32 %v724_v3, %v64_v39  ;;  %v128_v60 = vmul.f32 %v733_v6, %v110_v42  ;;  %v340_v33 = vld [vmem:[%s1359_s0 + $0x358] sm:$0xff]  ;;  %v26_v42 = vld [vmem:[%s1359_s0 + $0x140] sm:$0xff] }
  0x1e   :  { %v416_v61 = vadd.f32 %v402_v31, %v370_v50  ;;  %v395_v62 = vmul.f32 %v783_v25, %v377_v47  ;;  %v187_v63 = vadd.f32 %v173_v40, %v141_v52  ;;  %v265_v0 = vmul.f32 %v757_v15, %v247_v48  ;;  %v104_v50 = vld [vmem:[%s1359_s0 + $0x150] sm:$0xff] }
  0x1f   :  { %472 = vadd.xlane.f32.xlu2 %v456_v49  ;;  %v317_v5 = vadd.f32 %v303_v45, %v271_v55  ;;  %v441_v8 = vmul.f32 %v809_v36, %v423_v51  ;;  %v96_v11 = vadd.f32 %v82_v59, %v50_v58  ;;  %v174_v7 = vmul.f32 %v742_v9, %v156_v54  ;;  %v241_v49 = vld [vmem:[%s1359_s0 + $0x118] sm:$0xff]  ;;  %v287_v59 = vld [vmem:[%s1359_s0 + $0x120] sm:$0xff] }
  0x20   :  { %v462_v16 = vadd.f32 %v448_v43, %v416_v61  ;;  %v233_v17 = vadd.f32 %v219_v53, %v187_v63  ;;  %v311_v18 = vmul.f32 %v766_v19, %v293_v56  ;;  %v357_v20 = vmul.f32 %v778_v24, %v339_v57  ;;  %v58_v43 = vld [vmem:[%s1359_s0 + $0x148] sm:$0xff]  ;;  %v150_v55 = vld [vmem:[%s1359_s0 + $0x158] sm:$0xff] }
  0x21   :  { %v363_v26 = vadd.f32 %v349_v46, %v317_v5  ;;  %v142_v27 = vadd.f32 %v128_v60, %v96_v11  ;;  %v220_v23 = vmul.f32 %v751_v12, %v202_v2  ;;  %v43_v29 = vmul.f32 %v716_v1, %v25_v4  ;;  %v386_v46 = vld [vmem:[%s1359_s0 + $0x360] sm:$0xff]  ;;  %v432_v57 = vld [vmem:[%s1359_s0 + $0x368] sm:$0xff] }
  0x22   :  { %486 = vadd.xlane.f32.xlu1 %v462_v16  ;;  %v279_v31 = vadd.f32 %v265_v0, %v233_v17  ;;  %v403_v32 = vmul.f32 %v783_v25, %v385_v10  ;;  %v75_v34 = vmul.f32 %v724_v3, %v57_v13  ;;  %v121_v35 = vmul.f32 %v733_v6, %v103_v14  ;;  %v333_v60 = vld [vmem:[%s1359_s0 + $0x128] sm:$0xff]  ;;  %v196_v5 = vld [vmem:[%s1359_s0 + $0x160] sm:$0xff]  ;;  %v27_v13 = vld [vmem:[%s1359_s0 + $0x190] sm:$0xff] }
  0x23   :  { %v409_v38 = vadd.f32 %v395_v62, %v363_v26  ;;  %v449_v40 = vmul.f32 %v809_v36, %v431_v21  ;;  %v188_v41 = vadd.f32 %v174_v7, %v142_v27  ;;  %v266_v39 = vmul.f32 %v757_v15, %v248_v22  ;;  %v59_v14 = vld [vmem:[%s1359_s0 + $0x198] sm:$0xff]  ;;  %v105_v16 = vld [vmem:[%s1359_s0 + $0x1a0] sm:$0xff]  ;;  %v379_v22 = vld [vmem:[%s1359_s0 + $0x130] sm:$0xff] }
  0x24   :  { %v325_v44 = vadd.f32 %v311_v18, %v279_v31  ;;  %v312_v45 = vmul.f32 %v766_v19, %v294_v28  ;;  %v89_v47 = vadd.f32 %v75_v34, %v43_v29  ;;  %v167_v48 = vmul.f32 %v742_v9, %v149_v30  ;;  %v242_v26 = vld [vmem:[%s1359_s0 + $0x168] sm:$0xff]  ;;  %v425_v28 = vld [vmem:[%s1359_s0 + $0x138] sm:$0xff] }
  0x25   :  { %v455_v51 = vadd.f32 %v441_v8, %v409_v38  ;;  %v234_v52 = vadd.f32 %v220_v23, %v188_v41  ;;  %v358_v53 = vmul.f32 %v778_v24, %v340_v33  ;;  %v213_v54 = vmul.f32 %v751_v12, %v195_v37  ;;  %v151_v31 = vld [vmem:[%s1359_s0 + $0x1a8] sm:$0xff]  ;;  %v288_v33 = vld [vmem:[%s1359_s0 + $0x170] sm:$0xff]  ;;  %v334_v34 = vld [vmem:[%s1359_s0 + $0x178] sm:$0xff] }
  0x26   :  { %v371_v56 = vadd.f32 %v357_v20, %v325_v44  ;;  %v135_v58 = vadd.f32 %v121_v35, %v89_v47  ;;  %v44_v61 = vmul.f32 %v716_v1, %v26_v42  ;;  %v76_v62 = vmul.f32 %v724_v3, %v58_v43  ;;  %v197_v43 = vld [vmem:[%s1359_s0 + $0x1b0] sm:$0xff] }
  0x27   :  { %470 = vadd.xlane.f32.xlu0 %v455_v51  ;;  %v280_v63 = vadd.f32 %v266_v39, %v234_v52  ;;  %v404_v0 = vmul.f32 %v783_v25, %v386_v46  ;;  %v259_v2 = vmul.f32 %v757_v15, %v241_v49  ;;  %v122_v4 = vmul.f32 %v733_v6, %v104_v50  ;;  %v33_v44 = vld [vmem:[%s1359_s0 + $0x370] sm:$0xff]  ;;  %v65_v49 = vld [vmem:[%s1359_s0 + $0x378] sm:$0xff]  ;;  %v111_v50 = vld [vmem:[%s1359_s0 + $0x380] sm:$0xff] }
  0x28   :  { %v417_v8 = vadd.f32 %v403_v32, %v371_v56  ;;  %v181_v10 = vadd.f32 %v167_v48, %v135_v58  ;;  %v90_v11 = vadd.f32 %v76_v62, %v44_v61  ;;  %v168_v7 = vmul.f32 %v742_v9, %v150_v55  ;;  %v380_v55 = vld [vmem:[%s1359_s0 + $0x180] sm:$0xff]  ;;  %v243_v56 = vld [vmem:[%s1359_s0 + $0x1b8] sm:$0xff]  ;;  %v157_v61 = vld [vmem:[%s1359_s0 + $0x388] sm:$0xff] }
  0x29   :  { %v326_v17 = vadd.f32 %v312_v45, %v280_v63  ;;  %v450_v18 = vmul.f32 %v809_v36, %v432_v57  ;;  %v305_v20 = vmul.f32 %v766_v19, %v287_v59  ;;  %v351_v21 = vmul.f32 %v778_v24, %v333_v60 }
  0x2a   :  { %v463_v27 = vadd.f32 %v449_v40, %v417_v8  ;;  %v227_v23 = vadd.f32 %v213_v54, %v181_v10  ;;  %v136_v29 = vadd.f32 %v122_v4, %v90_v11  ;;  %v214_v30 = vmul.f32 %v751_v12, %v196_v5  ;;  %v203_v8 = vld [vmem:[%s1359_s0 + $0x390] sm:$0xff] }
  0x2b   :  { %v372_v32 = vadd.f32 %v358_v53, %v326_v17  ;;  %v45_v35 = vmul.f32 %v716_v1, %v27_v13  ;;  %v77_v37 = vmul.f32 %v724_v3, %v59_v14  ;;  %v123_v38 = vmul.f32 %v733_v6, %v105_v16  ;;  %v34_v13 = vld [vmem:[%s1359_s0 + $0x3c0] sm:$0xff] }
  0x2c   :  { %488 = vadd.xlane.f32.xlu2 %v463_v27  ;;  %v273_v40 = vadd.f32 %v259_v2, %v227_v23  ;;  %v397_v41 = vmul.f32 %v783_v25, %v379_v22  ;;  %v182_v39 = vadd.f32 %v168_v7, %v136_v29  ;;  %v260_v42 = vmul.f32 %v757_v15, %v242_v26  ;;  %v289_v2 = vld [vmem:[%s1359_s0 + $0x1c0] sm:$0xff] }
  0x2d   :  { %v418_v45 = vadd.f32 %v404_v0, %v372_v32  ;;  %v443_v46 = vmul.f32 %v809_v36, %v425_v28  ;;  %v91_v47 = vadd.f32 %v77_v37, %v45_v35  ;;  %v169_v48 = vmul.f32 %v742_v9, %v151_v31  ;;  %v426_v0 = vld [vmem:[%s1359_s0 + $0x188] sm:$0xff] }
  0x2e   :  { %v319_v51 = vadd.f32 %v305_v20, %v273_v40  ;;  %v228_v52 = vadd.f32 %v214_v30, %v182_v39  ;;  %v306_v53 = vmul.f32 %v766_v19, %v288_v33  ;;  %v352_v54 = vmul.f32 %v778_v24, %v334_v34 }
  0x2f   :  { %v464_v57 = vadd.f32 %v450_v18, %v418_v45  ;;  %v137_v58 = vadd.f32 %v123_v38, %v91_v47  ;;  %v215_v59 = vmul.f32 %v751_v12, %v197_v43  ;;  %v51_v60 = vmul.f32 %v716_v1, %v33_v44 }
  0x30   :  { %v365_v62 = vadd.f32 %v351_v21, %v319_v51  ;;  %v274_v63 = vadd.f32 %v260_v42, %v228_v52  ;;  %v83_v4 = vmul.f32 %v724_v3, %v65_v49  ;;  %v129_v5 = vmul.f32 %v733_v6, %v111_v50 }
  0x31   :  { %490 = vadd.xlane.f32.xlu1 %v464_v57  ;;  %v398_v10 = vmul.f32 %v783_v25, %v380_v55  ;;  %v183_v11 = vadd.f32 %v169_v48, %v137_v58  ;;  %v261_v7 = vmul.f32 %v757_v15, %v243_v56 }
  0x32   :  { %11 = vsyncpa [#allocation4], 0  ;;  %v411_v14 = vadd.f32 %v397_v41, %v365_v62  ;;  %v320_v16 = vadd.f32 %v306_v53, %v274_v63  ;;  %v335_v17 = vld [vmem:[%s1359_s0 + $0x1c8] sm:$0xff]  ;;  %v97_v18 = vadd.f32 %v83_v4, %v51_v60  ;;  %v175_v20 = vmul.f32 %v742_v9, %v157_v61  ;;  %v112_v22 = vld [vmem:[%s1359_s0 + $0x3d0] sm:$0xff]  ;;  %s679_s22 = smov [#allocation3]   ;;  %s630_s26 = sshll.u32 %s1364_s5, 4  ;;  %s631_s26 = int_to_ptr.hbm [resolvable:$true] %s630_s26 }
  0x33   :  { %v66_v21 = vld [vmem:[%s1359_s0 + $0x3c8] sm:$0xff]  ;;  %v444_v26 = vmul.f32 %v809_v36, %v426_v0  ;;  %v229_v27 = vadd.f32 %v215_v59, %v183_v11  ;;  %v307_v23 = vmul.f32 %v766_v19, %v289_v2  ;;  %v381_v28 = vld [vmem:[%s1359_s0 + $0x1d0] sm:$0xff]  ;;  %v221_v29 = vmul.f32 %v751_v12, %v203_v8  ;;  %v249_v30 = vld [vmem:[%s1359_s0 + $0x398] sm:$0xff]  ;;  %s628_s23 = sshll.u32 %s679_s22, 4  ;;  %s629_s23 = int_to_ptr.vmem [resolvable:$true] %s628_s23 }
  0x34   :  { %v457_v31 = vadd.f32 %v443_v46, %v411_v14  ;;  %v366_v32 = vadd.f32 %v352_v54, %v320_v16  ;;  %v427_v33 = vld [vmem:[%s1359_s0 + $0x1d8] sm:$0xff]  ;;  %v143_v34 = vadd.f32 %v129_v5, %v97_v18  ;;  %v52_v35 = vmul.f32 %v716_v1, %v34_v13  ;;  %v295_v41 = vld [vmem:[%s1359_s0 + $0x3a0] sm:$0xff]  ;;  %v35_v48 = vld [vmem:[%s1359_s0 + $0x410] sm:$0x3] }
  0x35   :  { %v158_v37 = vld [vmem:[%s1359_s0 + $0x3d8] sm:$0xff]  ;;  %v275_v38 = vadd.f32 %v261_v7, %v229_v27  ;;  %v353_v40 = vmul.f32 %v778_v24, %v335_v17  ;;  %v84_v39 = vmul.f32 %v724_v3, %v66_v21  ;;  %v130_v42 = vmul.f32 %v733_v6, %v112_v22  ;;  %v204_v43 = vld [vmem:[%s1359_s0 + $0x3e0] sm:$0xff]  ;;  %v341_v52 = vld [vmem:[%s1359_s0 + $0x3a8] sm:$0xff] }
  0x36   :  { %474 = vadd.xlane.f32.xlu0 %v457_v31  ;;  %v412_v44 = vadd.f32 %v398_v10, %v366_v32  ;;  %v399_v45 = vmul.f32 %v783_v25, %v381_v28  ;;  %v189_v46 = vadd.f32 %v175_v20, %v143_v34  ;;  %v267_v47 = vmul.f32 %v757_v15, %v249_v30  ;;  %v67_v49 = vld [vmem:[%s1359_s0 + $0x418] sm:$0x3]  ;;  %v250_v55 = vld [vmem:[%s1359_s0 + $0x3e8] sm:$0xff]  ;;  %v113_v56 = vld [vmem:[%s1359_s0 + $0x420] sm:$0x3] }
  0x37   :  { %v321_v50 = vadd.f32 %v307_v23, %v275_v38  ;;  %v445_v51 = vmul.f32 %v809_v36, %v427_v33  ;;  %v98_v53 = vadd.f32 %v84_v39, %v52_v35  ;;  %v176_v54 = vmul.f32 %v742_v9, %v158_v37  ;;  %v159_v61 = vld [vmem:[%s1359_s0 + $0x428] sm:$0x3]  ;;  %v387_v63 = vld [vmem:[%s1359_s0 + $0x3b0] sm:$0xff]  ;;  %v433_v0 = vld [vmem:[%s1359_s0 + $0x3b8] sm:$0xff] }
  0x38   :  { %v458_v57 = vadd.f32 %v444_v26, %v412_v44  ;;  %v235_v58 = vadd.f32 %v221_v29, %v189_v46  ;;  %v313_v59 = vmul.f32 %v766_v19, %v295_v41  ;;  %v222_v60 = vmul.f32 %v751_v12, %v204_v43  ;;  %v296_v4 = vld [vmem:[%s1359_s0 + $0x3f0] sm:$0xff]  ;;  %v342_v18 = vld [vmem:[%s1359_s0 + $0x3f8] sm:$0xff]  ;;  %v28_v22 = vld [vmem:[%s1359_s0 + $0x1e0] sm:$0x3] }
  0x39   :  { %v367_v62 = vadd.f32 %v353_v40, %v321_v50  ;;  %v144_v2 = vadd.f32 %v130_v42, %v98_v53  ;;  %v53_v5 = vmul.f32 %v716_v1, %v35_v48  ;;  %v85_v8 = vmul.f32 %v724_v3, %v67_v49  ;;  %v205_v14 = vld [vmem:[%s1359_s0 + $0x430] sm:$0x3]  ;;  %v60_v26 = vld [vmem:[%s1359_s0 + $0x1e8] sm:$0x3]  ;;  %v251_v30 = vld [vmem:[%s1359_s0 + $0x438] sm:$0x3] }
  0x3a   :  { %476 = vadd.xlane.f32.xlu2 %v458_v57  ;;  %v281_v10 = vadd.f32 %v267_v47, %v235_v58  ;;  %v359_v11 = vmul.f32 %v778_v24, %v341_v52  ;;  %v268_v7 = vmul.f32 %v757_v15, %v250_v55  ;;  %v131_v13 = vmul.f32 %v733_v6, %v113_v56  ;;  %v106_v31 = vld [vmem:[%s1359_s0 + $0x1f0] sm:$0x3]  ;;  %v152_v37 = vld [vmem:[%s1359_s0 + $0x1f8] sm:$0x3]  ;;  %v388_v41 = vld [vmem:[%s1359_s0 + $0x400] sm:$0xff] }
  0x3b   :  { %v413_v16 = vadd.f32 %v399_v45, %v367_v62  ;;  %v190_v17 = vadd.f32 %v176_v54, %v144_v2  ;;  %v99_v20 = vadd.f32 %v85_v8, %v53_v5  ;;  %v177_v21 = vmul.f32 %v742_v9, %v159_v61  ;;  %v297_v39 = vld [vmem:[%s1359_s0 + $0x440] sm:$0x3]  ;;  %v434_v50 = vld [vmem:[%s1359_s0 + $0x408] sm:$0xff]  ;;  %v389_v57 = vld [vmem:[%s1359_s0 + $0x450] sm:$0x3] }
  0x3c   :  { %v327_v27 = vadd.f32 %v313_v59, %v281_v10  ;;  %v405_v23 = vmul.f32 %v783_v25, %v387_v63  ;;  %v451_v28 = vmul.f32 %v809_v36, %v433_v0  ;;  %v314_v29 = vmul.f32 %v766_v19, %v296_v4  ;;  %v198_v48 = vld [vmem:[%s1359_s0 + $0x200] sm:$0x3]  ;;  %v244_v55 = vld [vmem:[%s1359_s0 + $0x208] sm:$0x3]  ;;  %v290_v63 = vld [vmem:[%s1359_s0 + $0x210] sm:$0x3] }
  0x3d   :  { %v459_v32 = vadd.f32 %v445_v51, %v413_v16  ;;  %v236_v33 = vadd.f32 %v222_v60, %v190_v17  ;;  %v145_v34 = vadd.f32 %v131_v13, %v99_v20  ;;  %v223_v35 = vmul.f32 %v751_v12, %v205_v14  ;;  %v435_v0 = vld [vmem:[%s1359_s0 + $0x458] sm:$0x3]  ;;  %v382_v17 = vld [vmem:[%s1359_s0 + $0x220] sm:$0x3] }
  0x3e   :  { %v373_v38 = vadd.f32 %v359_v11, %v327_v27  ;;  %v360_v40 = vmul.f32 %v778_v24, %v342_v18  ;;  %v46_v42 = vmul.f32 %v716_v1, %v28_v22  ;;  %v78_v43 = vmul.f32 %v724_v3, %v60_v26  ;;  %v343_v1 = vld [vmem:[%s1359_s0 + $0x448] sm:$0x3]  ;;  %v336_v10 = vld [vmem:[%s1359_s0 + $0x218] sm:$0x3] }
  0x3f   :  { %478 = vadd.xlane.f32.xlu1 %v459_v32  ;;  %v282_v44 = vadd.f32 %v268_v7, %v236_v33  ;;  %v191_v45 = vadd.f32 %v177_v21, %v145_v34  ;;  %v269_v46 = vmul.f32 %v757_v15, %v251_v30  ;;  %v124_v47 = vmul.f32 %v733_v6, %v106_v31  ;;  %v428_v21 = vld [vmem:[%s1359_s0 + $0x228] sm:$0x3]  ;;  %v535_v34 = vld [vmem:[%s1362_s3 + $0x30] sm:$0x3] }
  0x40   :  { %v419_v49 = vadd.f32 %v405_v23, %v373_v38  ;;  %v92_v3 = vadd.f32 %v78_v43, %v46_v42  ;;  %v170_v51 = vmul.f32 %v742_v9, %v152_v37  ;;  %v406_v53 = vmul.f32 %v783_v25, %v388_v41  ;;  %v532_v38 = vld [vmem:[%s1362_s3 + $0x18] sm:$0xff]  ;;  %v531_v41 = vld [vmem:[%s1362_s3 + $0x10] sm:$0xff]  ;;  %v529_v42 = vld [vmem:[%s1362_s3] sm:$0xff] }
  0x41   :  { %v328_v52 = vadd.f32 %v314_v29, %v282_v44  ;;  %v237_v6 = vadd.f32 %v223_v35, %v191_v45  ;;  %v315_v54 = vmul.f32 %v766_v19, %v297_v39  ;;  %v216_v59 = vmul.f32 %v751_v12, %v198_v48  ;;  %v533_v35 = vld [vmem:[%s1362_s3 + $0x20] sm:$0xff]  ;;  %v530_v39 = vld [vmem:[%s1362_s3 + $0x8] sm:$0xff] }
  0x42   :  { %v465_v56 = vadd.f32 %v451_v28, %v419_v49  ;;  %v138_v58 = vadd.f32 %v124_v47, %v92_v3  ;;  %v452_v9 = vmul.f32 %v809_v36, %v434_v50  ;;  %v361_v62 = vmul.f32 %v778_v24, %v343_v1 }
  0x43   :  { %v374_v60 = vadd.f32 %v360_v40, %v328_v52  ;;  %v283_v61 = vadd.f32 %v269_v46, %v237_v6  ;;  %v262_v4 = vmul.f32 %v757_v15, %v244_v55  ;;  %v407_v8 = vmul.f32 %v783_v25, %v389_v57 }
  0x44   :  { %492 = vadd.xlane.f32.xlu0 %v465_v56  ;;  %v184_v2 = vadd.f32 %v170_v51, %v138_v58  ;;  %v308_v7 = vmul.f32 %v766_v19, %v290_v63  ;;  %v453_v16 = vmul.f32 %v809_v36, %v435_v0  ;;  %v354_v18 = vmul.f32 %v778_v24, %v336_v10 }
  0x45   :  { %v420_v5 = vadd.f32 %v406_v53, %v374_v60  ;;  %v329_v12 = vadd.f32 %v315_v54, %v283_v61  ;;  %vm480_vm0 = vcmask 1041408   ;;  %v400_v19 = vmul.f32 %v783_v25, %v382_v17  ;;  %v534_v25 = vld [vmem:[%s1362_s3 + $0x28] sm:$0xff] }
  0x46   :  { %v230_v11 = vadd.f32 %v216_v59, %v184_v2  ;;  %v446_v23 = vmul.f32 %v809_v36, %v428_v21  ;;  %639 = vmatpush.msk.msra.mxu0 %vm480_vm0, %v535_v34  ;;  %v554_v46 = vlaneseq  ;;  %v500_v47 = vstv %s1361_s2 }
  0x47   :  { %v466_v13 = vadd.f32 %v452_v9, %v420_v5  ;;  %v375_v14 = vadd.f32 %v361_v62, %v329_v12  ;;  %vm559_vm1 = vcmask 130112   ;;  %vm563_vm2 = vcmask 195712  }
  0x48   :  { %v276_v15 = vadd.f32 %v262_v4, %v230_v11  ;;  %612 = vmatpush.msra.mxu0 %v534_v25  ;;  %v555_v1 = vand.u32 127, %v554_v46  ;;  %vm567_vm3 = vcmask 261312   ;;  %vm571_vm4 = vcmask 326912  }
  0x49   :  { %494 = vadd.xlane.f32.xlu2 %v466_v13  ;;  %v421_v20 = vadd.f32 %v407_v8, %v375_v14  ;;  %vm575_vm5 = vcmask 392512   ;;  %vm579_vm6 = vcmask 458112   ;;  %vm594_vm7 = vcmask 1041409  }
  0x4a   :  { %v322_v22 = vadd.f32 %v308_v7, %v276_v15  ;;  %613 = vmatpush.msra.mxu0 %v533_v35  ;;  %v557_v6 = vadd.s32 4294967288, %v555_v1  ;;  %v561_v59 = vadd.s32 4294967280, %v555_v1  ;;  %v565_v2 = vadd.s32 4294967272, %v555_v1 }
  0x4b   :  { %v467_v26 = vadd.f32 %v453_v16, %v421_v20  ;;  %v569_v15 = vadd.s32 4294967264, %v555_v1  ;;  %vm596_vm8 = vcmask 408576  }
  0x4c   :  { %v368_v27 = vadd.f32 %v354_v18, %v322_v22  ;;  %614 = vmatpush.msra.mxu0 %v532_v38  ;;  %v573_v18 = vadd.s32 4294967256, %v555_v1 }
  0x4d   :  { %v496_v28 = vsel %vm480_vm0, %v467_v26, 0.0 }
  0x4e   :  { %497 = vadd.xlane.f32.xlu1 %v496_v28  ;;  %v414_v29 = vadd.f32 %v400_v19, %v368_v27  ;;  %615 = vmatpush.msra.mxu0 %v531_v41 }
  0x50   :  { %v460_v30 = vadd.f32 %v446_v23, %v414_v29  ;;  %616 = vmatpush.msra.mxu0 %v530_v39  ;;  %v577_v29 = vadd.s32 4294967248, %v555_v1 }
  0x52   :  { %v481_v24 = vsel %vm480_vm0, %v460_v30, 0.0  ;;  %617 = vmatpush.msra.mxu0 %v529_v42 }
  0x53   :  { %482 = vadd.xlane.f32.xlu0 %v481_v24 }
  0x8a   :  { %v485_v31 = vpop.xlane.xlu1 %484 }
  0x8b   :  { %v508_v3 = vadd.f32 %v500_v47, %v485_v31 }
  0x8d   :  { %v522_v58 = vmax.f32 %v508_v3, 0.0  ;;  %v652_v3 = vld [vmem:[%s1363_s4] ss:$0 sm:$0xff] }
  0x8f   :  { %v469_v32 = vpop.xlane.xlu0 %468  ;;  %v581_v11 = vperm.slane %v522_v58, %v555_v1 }
  0x90   :  { %v501_v52 = vadd.f32 %v500_v47, %v469_v32 }
  0x92   :  { %v473_v33 = vpop.xlane.xlu2 %472  ;;  %v515_v62 = vmax.f32 %v501_v52, 0.0 }
  0x93   :  { %v503_v60 = vadd.f32 %v500_v47, %v473_v33 }
  0x94   :  { %v556_v16 = vperm.slane %v515_v62, %v555_v1 }
  0x95   :  { %v487_v36 = vpop.xlane.xlu1 %486  ;;  %v517_v7 = vmax.f32 %v503_v60, 0.0 }
  0x96   :  { %v509_v48 = vadd.f32 %v500_v47, %v487_v36 }
  0x97   :  { %v562_v30 = vperm.slane %v517_v7, %v561_v59 }
  0x98   :  { %v523_v54 = vmax.f32 %v509_v48, 0.0 }
  0x9a   :  { %v471_v37 = vpop.xlane.xlu0 %470  ;;  %v582_v0 = vperm.slane %v523_v54, %v557_v6 }
  0x9b   :  { %v502_v49 = vadd.f32 %v500_v47, %v471_v37 }
  0x9c   :  { %v583_v21 = vsel %vm559_vm1, %v582_v0, %v581_v11 }
  0x9d   :  { %v516_v56 = vmax.f32 %v502_v49, 0.0 }
  0x9f   :  { %v489_v40 = vpop.xlane.xlu2 %488  ;;  %v558_v12 = vperm.slane %v516_v56, %v557_v6 }
  0xa0   :  { %v510_v53 = vadd.f32 %v500_v47, %v489_v40 }
  0xa1   :  { %v560_v27 = vsel %vm559_vm1, %v558_v12, %v556_v16 }
  0xa2   :  { %v524_v63 = vmax.f32 %v510_v53, 0.0  ;;  %v564_v25 = vsel %vm563_vm2, %v562_v30, %v560_v27 }
  0xa4   :  { %v491_v43 = vpop.xlane.xlu1 %490  ;;  %v584_v17 = vperm.slane %v524_v63, %v561_v59 }
  0xa5   :  { %v511_v55 = vadd.f32 %v500_v47, %v491_v43 }
  0xa6   :  { %v585_v33 = vsel %vm563_vm2, %v584_v17, %v583_v21 }
  0xa7   :  { %v525_v4 = vmax.f32 %v511_v55, 0.0 }
  0xa9   :  { %v475_v44 = vpop.xlane.xlu0 %474  ;;  %v586_v22 = vperm.slane %v525_v4, %v565_v2 }
  0xaa   :  { %v504_v9 = vadd.f32 %v500_v47, %v475_v44 }
  0xab   :  { %v587_v34 = vsel %vm567_vm3, %v586_v22, %v585_v33 }
  0xac   :  { %v518_v13 = vmax.f32 %v504_v9, 0.0 }
  0xad   :  { %v477_v45 = vpop.xlane.xlu2 %476 }
  0xae   :  { %v505_v8 = vadd.f32 %v500_v47, %v477_v45  ;;  %v566_v24 = vperm.slane %v518_v13, %v565_v2 }
  0xb0   :  { %v519_v23 = vmax.f32 %v505_v8, 0.0  ;;  %v568_v39 = vsel %vm567_vm3, %v566_v24, %v564_v25 }
  0xb2   :  { %v479_v50 = vpop.xlane.xlu1 %478  ;;  %v570_v37 = vperm.slane %v519_v23, %v569_v15 }
  0xb3   :  { %v506_v14 = vadd.f32 %v500_v47, %v479_v50 }
  0xb4   :  { %v572_v45 = vsel %vm571_vm4, %v570_v37, %v568_v39 }
  0xb5   :  { %v520_v31 = vmax.f32 %v506_v14, 0.0 }
  0xb7   :  { %v493_v51 = vpop.xlane.xlu0 %492  ;;  %v574_v42 = vperm.slane %v520_v31, %v573_v18 }
  0xb8   :  { %v512_v57 = vadd.f32 %v500_v47, %v493_v51 }
  0xb9   :  { %v576_v49 = vsel %vm575_vm5, %v574_v42, %v572_v45 }
  0xba   :  { %v526_v10 = vmax.f32 %v512_v57, 0.0 }
  0xbc   :  { %v495_v61 = vpop.xlane.xlu2 %494  ;;  %v588_v28 = vperm.slane %v526_v10, %v569_v15 }
  0xbd   :  { %v513_v5 = vadd.f32 %v500_v47, %v495_v61 }
  0xbe   :  { %v589_v38 = vsel %vm571_vm4, %v588_v28, %v587_v34 }
  0xbf   :  { %v527_v19 = vmax.f32 %v513_v5, 0.0 }
  0xc1   :  { %v498_v20 = vpop.xlane.xlu1 %497  ;;  %v590_v36 = vperm.slane %v527_v19, %v573_v18 }
  0xc2   :  { %v514_v26 = vadd.f32 %v500_v47, %v498_v20 }
  0xc3   :  { %v591_v44 = vsel %vm575_vm5, %v590_v36, %v589_v38 }
  0xc4   :  { %v528_v32 = vmax.f32 %v514_v26, 0.0 }
  0xc6   :  { %v483_v35 = vpop.xlane.xlu0 %482  ;;  %v592_v40 = vperm.slane %v528_v32, %v577_v29 }
  0xc7   :  { %v507_v41 = vadd.f32 %v500_v47, %v483_v35 }
  0xc8   :  { %v593_v48 = vsel %vm579_vm6, %v592_v40, %v591_v44 }
  0xc9   :  { %v521_v43 = vmax.f32 %v507_v41, 0.0 }
  0xcb   :  { %v578_v46 = vperm.slane %v521_v43, %v577_v29 }
  0xcd   :  { %v580_v50 = vsel %vm579_vm6, %v578_v46, %v576_v49 }
  0xce   :  { %v595_v1 = vsel %vm594_vm7, %v593_v48, %v580_v50 }
  0xcf   :  { %640 = vmatmul.msk.f32.vlgmr.msra.gmra.mxu0 %vm596_vm8, %v595_v1 }
 0x14c   :  { %v619_v47 = vpop.f32.mrf.mxu0 }
 0x14d   :  { %v620_v51 = vadd.f32 %v652_v3, %v619_v47 }
 0x14f   :  { %622 = vst [vmem:[#allocation3] sm:$0x3] %v620_v51 }
 0x150   :  { %633 = dma.vmem_to_hbm [thread:$0]  %s629_s23, 32, %s631_s26, [#allocation4]  }
 0x151   :  { %677 = dma.done.wait [#allocation4], 32  }
 0x152   :  { %678 = vsyncadd [#allocation4], 4294967264 }
 0x153   :  { %638 = vsyncpa [#allocation4], 1 }

</bundles_post_ra>
